<compile_context>
chip_gen: v7x
topology: tpu7x:2x2x1
jax: 0.10.0
libtpu: 0.0.40
codegen_flags: <defaults>
</compile_context>

<pallas_src>
import collections
import functools

import jax
import jax.numpy as jnp
from jax.experimental import pallas as pl
from jax.experimental.pallas import tpu as pltpu

LANE = 128  # vreg lane width: all weights/biases/activations padded to this many columns
SUB = 8     # f32 sublane tile: every slab section starts on an 8-row boundary

Layout = collections.namedtuple(
    "Layout", ["I", "H1", "H2", "C", "w1", "b1", "w2", "b2", "w3", "b3", "rows"])


def _round_up(n, m):
    return ((n + m - 1) // m) * m


def pack_params(w1, b1, w2, b2, w3, b3):
    """One-time layout work: pack all params into a single (rows, 128) f32 slab.

    Weights are stored pre-transposed (in, out).  Columns are zero-padded to 128
    lanes; w2/w3 rows are zero-padded to 128 so they contract directly against the
    128-lane hidden activations; every section starts on an 8-row boundary.
    """
    I, H1 = w1.shape
    _, H2 = w2.shape
    _, C = w3.shape
    assert max(H1, H2, C) <= LANE, "hidden/output sizes must fit in one 128-lane vreg"

    def pad(a, rows):
        r, c = a.shape
        return jnp.pad(a.astype(jnp.float32), ((0, rows - r), (0, LANE - c)))

    sections = [
        ("w1", pad(w1, _round_up(I, SUB))),
        ("b1", pad(b1.reshape(1, -1), SUB)),
        ("w2", pad(w2, LANE)),   # rows padded to 128: contracts against 128-lane h1
        ("b2", pad(b2.reshape(1, -1), SUB)),
        ("w3", pad(w3, LANE)),   # rows padded to 128: contracts against 128-lane h2
        ("b3", pad(b3.reshape(1, -1), SUB)),
    ]
    offs, row, blocks = {}, 0, []
    for name, blk in sections:
        offs[name] = row
        row += blk.shape[0]
        blocks.append(blk)
    slab = jnp.concatenate(blocks, axis=0)
    layout = Layout(I=I, H1=H1, H2=H2, C=C, rows=row, **offs)
    return slab, layout


def densenet_kernel(x_ref, p_ref, out_ref, *, L):
    """(TILE_B, I) x tile -> (TILE_B, 128) logits tile (cols C..127 are exactly 0)."""
    x = x_ref[...]                                           # (TB, I)
    w1 = p_ref[L.w1:L.w1 + L.I, :]                           # (I, 128)  static, aligned slices
    b1 = p_ref[L.b1:L.b1 + 1, :]                             # (1, 128)
    w2 = p_ref[L.w2:L.w2 + LANE, :]                          # (128, 128)
    b2 = p_ref[L.b2:L.b2 + 1, :]
    w3 = p_ref[L.w3:L.w3 + LANE, :]                          # (128, 128)
    b3 = p_ref[L.b3:L.b3 + 1, :]

    h1 = jnp.tanh(jnp.dot(x, w1, preferred_element_type=jnp.float32) + b1)   # (TB, 128)
    h2 = jnp.tanh(jnp.dot(h1, w2, preferred_element_type=jnp.float32) + b2)  # (TB, 128)
    out = jnp.dot(h2, w3, preferred_element_type=jnp.float32) + b3           # (TB, 128)
    out_ref[...] = out.astype(out_ref.dtype)


def _forward_padded(x, slab, layout, tile_b):
    """Returns the lane-dense (B_padded, 128) logits slab."""
    B, I = x.shape
    assert I == layout.I
    tb = min(tile_b, _round_up(B, SUB))
    tb = _round_up(tb, SUB)
    Bp = _round_up(B, tb)
    if Bp != B:
        x = jnp.pad(x, ((0, Bp - B), (0, 0)))

    return pl.pallas_call(
        functools.partial(densenet_kernel, L=layout),
        out_shape=jax.ShapeDtypeStruct((Bp, LANE), jnp.float32),
        grid=(Bp // tb,),
        in_specs=[
            pl.BlockSpec((tb, I), lambda i: (i, 0)),                 # stream x tiles
            pl.BlockSpec((layout.rows, LANE), lambda i: (0, 0)),     # weights stay resident
        ],
        out_specs=pl.BlockSpec((tb, LANE), lambda i: (i, 0)),        # lane-dense output tiles
        compiler_params=pltpu.CompilerParams(
            dimension_semantics=("parallel",)),                      # megacore on v7x
    )(x, slab)


@functools.partial(jax.jit, static_argnames=("layout", "tile_b"))
def densenet_forward_padded(x, slab, *, layout, tile_b=128):
    """Preferred entry point for fused consumers: returns the padded (B_padded, 128) slab."""
    return _forward_padded(x, slab, layout, tile_b)


@functools.partial(jax.jit, static_argnames=("layout", "tile_b"))
def densenet_forward(x, slab, *, layout, tile_b=128):
    """Module-faithful entry point: returns (B, 2) logits; slice fused into the same jit."""
    out = _forward_padded(x, slab, layout, tile_b)
    return out[: x.shape[0], : layout.C]


def ref_forward(x, w1, b1, w2, b2, w3, b3):
    """Pure-JAX reference matching the PyTorch DenseNet semantics."""
    h1 = jnp.tanh(x @ w1 + b1)
    h2 = jnp.tanh(h1 @ w2 + b2)
    return h2 @ w3 + b3


def init_params(key, input_size, hs1, hs2, n_out=2):
    """Deterministic synthetic params, PyTorch nn.Linear-style uniform init.

    Weights stored pre-transposed (in_features, out_features) so the kernel runs x @ W.
    """
    ks = jax.random.split(key, 6)
    u = lambda k, shp, s: jax.random.uniform(k, shp, jnp.float32, -s, s)
    s1 = 1.0 / jnp.sqrt(input_size)
    s2 = 1.0 / jnp.sqrt(hs1)
    s3 = 1.0 / jnp.sqrt(hs2)
    w1 = u(ks[0], (input_size, hs1), s1)
    b1 = u(ks[1], (1, hs1), s1)
    w2 = u(ks[2], (hs1, hs2), s2)
    b2 = u(ks[3], (1, hs2), s2)
    w3 = u(ks[4], (hs2, n_out), s3)
    b3 = u(ks[5], (1, n_out), s3)
    return w1, b1, w2, b2, w3, b3


if __name__ == "__main__":
    # Shapes consistent with the module: input_size=16, hidden_size=(32, 16), 2 classes.
    B, I, H1, H2, C = 8, 16, 32, 16, 2
    key = jax.random.PRNGKey(0)
    kx, kx2, kp = jax.random.split(key, 3)

    x = jax.random.normal(kx, (B, I), jnp.float32)
    w1, b1, w2, b2, w3, b3 = init_params(kp, I, H1, H2, C)

    # One-time packing/padding of params into the lane-dense slab.
    slab, layout = pack_params(w1, b1, w2, b2, w3, b3)

    # Small batch (single grid step).
    out = jax.block_until_ready(densenet_forward(x, slab, layout=layout))
    ref = ref_forward(x, w1, b1, w2, b2, w3, b3)
    assert out.shape == (B, C), f"bad output shape {out.shape}"
    assert jnp.allclose(out, ref, atol=1e-5, rtol=1e-5), (
        f"mismatch: max abs err {jnp.max(jnp.abs(out - ref))}")

    # Larger batch exercising the grid (2 tiles of 128 rows, weights stay resident),
    # plus the padded-slab entry point.
    B2 = 256
    x2 = jax.random.normal(kx2, (B2, I), jnp.float32)
    out2 = jax.block_until_ready(densenet_forward(x2, slab, layout=layout))
    ref2 = ref_forward(x2, w1, b1, w2, b2, w3, b3)
    assert out2.shape == (B2, C)
    assert jnp.allclose(out2, ref2, atol=1e-5, rtol=1e-5), (
        f"mismatch (gridded): max abs err {jnp.max(jnp.abs(out2 - ref2))}")

    out2_pad = jax.block_until_ready(
        densenet_forward_padded(x2, slab, layout=layout))
    assert out2_pad.shape == (B2, LANE)
    assert jnp.allclose(out2_pad[:, :C], ref2, atol=1e-5, rtol=1e-5)
    assert jnp.all(out2_pad[:, C:] == 0.0)   # padded lanes are exactly zero

    print("KERNEL_OK")
</pallas_src>

<mosaic_0001>
module attributes {stable_mosaic.version = 11 : i64} {
  func.func @densenet_kernel(%arg0: i32, %arg1: memref<8x16xf32, #tpu.memory_space<vmem>>, %arg2: memref<296x128xf32, #tpu.memory_space<vmem>>, %arg3: memref<8x128xf32, #tpu.memory_space<vmem>>) attributes {dimension_semantics = [#tpu.dimension_semantics<parallel>], iteration_bounds = array<i64: 1>, scalar_prefetch = 0 : i64, scratch_operands = 0 : i64, tpu.core_type = #tpu.core_type<tc>, window_params = [{transform_indices = @transform_0, window_bounds = array<i64: 8, 16>}, {pipeline_mode = #tpu.pipeline_mode<synchronous>, transform_indices = @transform_1, window_bounds = array<i64: 296, 128>}, {transform_indices = @transform_2, window_bounds = array<i64: 8, 128>}]} {
    %c0 = arith.constant 0 : index
    %c0_0 = arith.constant 0 : index
    %0 = vector.load %arg1[%c0, %c0_0] : memref<8x16xf32, #tpu.memory_space<vmem>>, vector<8x16xf32>
    %c0_1 = arith.constant 0 : index
    %c0_2 = arith.constant 0 : index
    %1 = vector.load %arg2[%c0_1, %c0_2] : memref<296x128xf32, #tpu.memory_space<vmem>>, vector<16x128xf32>
    %c16 = arith.constant 16 : index
    %c0_3 = arith.constant 0 : index
    %2 = vector.load %arg2[%c16, %c0_3] : memref<296x128xf32, #tpu.memory_space<vmem>>, vector<1x128xf32>
    %c24 = arith.constant 24 : index
    %c0_4 = arith.constant 0 : index
    %3 = vector.load %arg2[%c24, %c0_4] : memref<296x128xf32, #tpu.memory_space<vmem>>, vector<128x128xf32>
    %c152 = arith.constant 152 : index
    %c0_5 = arith.constant 0 : index
    %4 = vector.load %arg2[%c152, %c0_5] : memref<296x128xf32, #tpu.memory_space<vmem>>, vector<1x128xf32>
    %c160 = arith.constant 160 : index
    %c0_6 = arith.constant 0 : index
    %5 = vector.load %arg2[%c160, %c0_6] : memref<296x128xf32, #tpu.memory_space<vmem>>, vector<128x128xf32>
    %c288 = arith.constant 288 : index
    %c0_7 = arith.constant 0 : index
    %6 = vector.load %arg2[%c288, %c0_7] : memref<296x128xf32, #tpu.memory_space<vmem>>, vector<1x128xf32>
    %cst = arith.constant dense<0.000000e+00> : vector<8x128xf32>
    %7 = tpu.matmul %0, %1, %cst {dimension_numbers = #tpu.dot_dimension_numbers<[1], [0], [0], [1], [0, 0, 1, 1], [], []>} : vector<8x16xf32>, vector<16x128xf32>, vector<8x128xf32> -> vector<8x128xf32>
    %8 = vector.broadcast %2 : vector<1x128xf32> to vector<8x128xf32>
    %9 = arith.addf %7, %8 : vector<8x128xf32>
    %10 = math.tanh %9 : vector<8x128xf32>
    %cst_8 = arith.constant dense<0.000000e+00> : vector<8x128xf32>
    %11 = tpu.matmul %10, %3, %cst_8 {dimension_numbers = #tpu.dot_dimension_numbers<[1], [0], [0], [1], [0, 0, 1, 1], [], []>} : vector<8x128xf32>, vector<128x128xf32>, vector<8x128xf32> -> vector<8x128xf32>
    %12 = vector.broadcast %4 : vector<1x128xf32> to vector<8x128xf32>
    %13 = arith.addf %11, %12 : vector<8x128xf32>
    %14 = math.tanh %13 : vector<8x128xf32>
    %cst_9 = arith.constant dense<0.000000e+00> : vector<8x128xf32>
    %15 = tpu.matmul %14, %5, %cst_9 {dimension_numbers = #tpu.dot_dimension_numbers<[1], [0], [0], [1], [0, 0, 1, 1], [], []>} : vector<8x128xf32>, vector<128x128xf32>, vector<8x128xf32> -> vector<8x128xf32>
    %16 = vector.broadcast %6 : vector<1x128xf32> to vector<8x128xf32>
    %17 = arith.addf %15, %16 : vector<8x128xf32>
    %c0_10 = arith.constant 0 : index
    %c0_11 = arith.constant 0 : index
    %18 = vector.load %arg3[%c0_10, %c0_11] : memref<8x128xf32, #tpu.memory_space<vmem>>, vector<8x128xf32>
    tpu.vector_store %arg3[%c0_10, %c0_11], %17 {strides = array<i32>} : memref<8x128xf32, #tpu.memory_space<vmem>>, vector<8x128xf32>,
    return
  }
  func.func @transform_0(%arg0: i32) -> (i32, i32) {
    %c0_i32 = arith.constant 0 : i32
    %c0_i32_0 = arith.constant 0 : i32
    return %arg0, %c0_i32 : i32, i32
  }
  func.func @transform_1(%arg0: i32) -> (i32, i32) {
    %c0_i32 = arith.constant 0 : i32
    %c0_i32_0 = arith.constant 0 : i32
    %c0_i32_1 = arith.constant 0 : i32
    return %c0_i32, %c0_i32_0 : i32, i32
  }
  func.func @transform_2(%arg0: i32) -> (i32, i32) {
    %c0_i32 = arith.constant 0 : i32
    %c0_i32_0 = arith.constant 0 : i32
    return %arg0, %c0_i32 : i32, i32
  }
}

</mosaic_0001>

<bundles_post_ra>
// kernel: densenet_forward.1
= control target key start
LH: loop header
LB: loop body
LE: loop exit
PB: predicated region body
PF: predicated region fallthrough
CT: control target
= control target key end

     0   :  { %7 = vsyncpa [#allocation3], 0  ;;  %s614_s0 = inlined_call_operand.hbm [shape: f32[8,16], index: 0, kind: input, shape index: {}]   ;;  %s615_s1 = inlined_call_operand.hbm [shape: f32[296,128], index: 1, kind: input, shape index: {}]   ;;  %s616_s2 = inlined_call_operand.vmem [shape: f32[8,128], index: 2, kind: output, shape index: {}]  }
   0x1   :  { %8 = vsyncpa [#allocation5], 0  ;;  %s538_s9 = smov [#allocation2]   ;;  %s539_s11 = smov [#allocation4]  }
   0x2   :  { %s15_s10 = sshll.u32 %s538_s9, 4  ;;  %s24_s12 = sshll.u32 %s539_s11, 4  ;;  %s16_s10 = int_to_ptr.vmem [resolvable:$true] %s15_s10  ;;  %s560_s12 = int_to_ptr.vmem [resolvable:$true] %s24_s12 }
   0x3   :  { %s490_s15 = scalar_lea.hbm %s614_s0, 128 }
   0x4   :  { %p491_p0 = scmp.ne.s32.totalorder %s614_s0, %s490_s15  ;;  %p494_p1 = scmp.lt.u32.totalorder %s490_s15, %s614_s0 }
   0x6   :  { %p496_p2 = pnand %p494_p1, %p491_p0 }
   0x8   :  { %499 = shalt.err (!%p496_p2)
}
   0x9   :  { %s500_s20 = scalar_lea.vmem %s16_s10, 128  ;;  %p505_p4 = scmp.lt.s32.totalorder %s16_s10, %s16_s10 }
   0xa   :  { %p501_p3 = scmp.ne.s32.totalorder %s16_s10, %s500_s20  ;;  %p506_p5 = scmp.lt.s32.totalorder %s500_s20, %s500_s20 }
   0xc   :  { %p507_p6 = por %p506_p5, %p505_p4 }
   0xe   :  { %p508_p7 = pnand %p507_p6, %p501_p3 }
  0x10   :  { %511 = shalt.err (!%p508_p7)
}
  0x11   :  { %18 = dma.hbm_to_vmem [thread:$0]  %s614_s0, 128, %s16_s10, [#allocation3]  }
  0x12   :  { %s512_s25 = scalar_lea.hbm %s615_s1, 4736 }
  0x13   :  { %p513_p8 = scmp.ne.s32.totalorder %s615_s1, %s512_s25  ;;  %p516_p9 = scmp.lt.u32.totalorder %s512_s25, %s615_s1 }
  0x15   :  { %p518_p10 = pnand %p516_p9, %p513_p8 }
  0x17   :  { %521 = shalt.err (!%p518_p10)
}
  0x18   :  { %s522_s30 = scalar_lea.vmem %s560_s12, 4736  ;;  %p527_p12 = scmp.lt.s32.totalorder %s560_s12, %s560_s12 }
  0x19   :  { %p523_p11 = scmp.ne.s32.totalorder %s560_s12, %s522_s30  ;;  %p528_p13 = scmp.lt.s32.totalorder %s522_s30, %s522_s30 }
  0x1b   :  { %p529_p0 = por %p528_p13, %p527_p12 }
  0x1d   :  { %p530_p1 = pnand %p529_p0, %p523_p11 }
  0x1f   :  { %533 = shalt.err (!%p530_p1)
}
  0x20   :  { %s540_s0 = smov 128   ;;  %s541_s3 = smov 8  }
  0x21   :  { %30 = dma.hbm_to_vmem [thread:$0]  %s615_s1, 4736, %s560_s12, [#allocation5], %s540_s0, %s540_s0, %s541_s3  }
  0x22   :  { %534 = dma.done.wait [#allocation3], 128  }
  0x23   :  { %535 = vsyncadd [#allocation3], 4294967168 }
  0x24   :  { %536 = dma.done.wait [#allocation5], 4736  }
  0x25   :  { %537 = vsyncadd [#allocation5], 4294962560  ;;  %v542_v0 = vmov 0.0|0.0   ;;  %vm543_vm0 = vmmov 0   ;;  %v544_v1 = vmov 0.0   ;;  %v38_v2 = vld [vmem:[#allocation4] sm:$0xff] }
  0x26   :  { %428 = vmatprep.subr.bf16.mxu0 %v542_v0  ;;  %355 = vmatprep.mubr.msk.f32.mxu0 %vm543_vm0, %v544_v1  ;;  %v39_v3 = vld [vmem:[#allocation4 + $0x8] sm:$0xff]  ;;  %v41_v5 = vld [vmem:[#allocation4 + $0x18] sm:$0xff]  ;;  %v42_v6 = vld [vmem:[#allocation4 + $0x20] sm:$0xff]  ;;  %vm79_vm1 = vcmask 130048  }
  0x27   :  { %431 = vmatprep.subr.bf16.mxu1 %v542_v0  ;;  %390 = vmatprep.mubr.msk.f32.mxu1 %vm543_vm0, %v544_v1  ;;  %v429_v4 = vpack.c.bf16 %v39_v3, %v38_v2  ;;  %v43_v7 = vld [vmem:[#allocation4 + $0x28] sm:$0xff]  ;;  %v432_v8 = vpack.c.bf16 %v42_v6, %v41_v5  ;;  %v44_v9 = vld [vmem:[#allocation4 + $0x30] sm:$0xff]  ;;  %v37_v10 = vld [vmem:[#allocation2] sm:$0xff] }
  0x28   :  { %v435_v11 = vpack.c.bf16 %v44_v9, %v43_v7  ;;  %v45_v12 = vld [vmem:[#allocation4 + $0x38] sm:$0xff]  ;;  %v46_v13 = vld [vmem:[#allocation4 + $0x40] sm:$0xff]  ;;  %v47_v15 = vld [vmem:[#allocation4 + $0x48] sm:$0xff] }
  0x29   :  { %430 = vmatpush3.bf16.msra.mxu0 %v429_v4  ;;  %433 = vmatpush3.bf16.msra.mxu1 %v432_v8  ;;  %v438_v14 = vpack.c.bf16 %v46_v13, %v45_v12  ;;  %v48_v16 = vld [vmem:[#allocation4 + $0x50] sm:$0xff]  ;;  %v49_v18 = vld [vmem:[#allocation4 + $0x58] sm:$0xff]  ;;  %v50_v19 = vld [vmem:[#allocation4 + $0x60] sm:$0xff] }
  0x2a   :  { %455 = vmatprep.subr.bf16.mxu0 %v542_v0  ;;  %434 = vmatprep.subr.bf16.mxu1 %v542_v0  ;;  %v441_v17 = vpack.c.bf16 %v48_v16, %v47_v15  ;;  %v444_v20 = vpack.c.bf16 %v50_v19, %v49_v18  ;;  %v51_v21 = vld [vmem:[#allocation4 + $0x68] sm:$0xff]  ;;  %v52_v22 = vld [vmem:[#allocation4 + $0x70] sm:$0xff]  ;;  %v53_v24 = vld [vmem:[#allocation4 + $0x78] sm:$0xff] }
  0x2b   :  { %v447_v23 = vpack.c.bf16 %v52_v22, %v51_v21  ;;  %v54_v25 = vld [vmem:[#allocation4 + $0x80] sm:$0xff]  ;;  %v55_v27 = vld [vmem:[#allocation4 + $0x88] sm:$0xff]  ;;  %v56_v28 = vld [vmem:[#allocation4 + $0x90] sm:$0xff] }
  0x2c   :  { %356 = vmatmul.mubr.msk.f32.vlgmr.msra.gmra.mrb[0].mxu0 %vm79_vm1, %v37_v10  ;;  %v450_v26 = vpack.c.bf16 %v54_v25, %v53_v24  ;;  %v453_v29 = vpack.c.bf16 %v56_v28, %v55_v27  ;;  %v58_v30 = vld [vmem:[#allocation4 + $0xa0] sm:$0xff]  ;;  %v59_v31 = vld [vmem:[#allocation4 + $0xa8] sm:$0xff]  ;;  %v60_v32 = vld [vmem:[#allocation4 + $0xb0] sm:$0xff] }
  0x2d   :  { %425 = vmatprep.mubr.msk.f32.mxu0 %vm543_vm0, %v544_v1  ;;  %436 = vmatpush3.bf16.msra.mxu1 %v435_v11  ;;  %v456_v33 = vpack.c.bf16 %v59_v31, %v58_v30  ;;  %v61_v34 = vld [vmem:[#allocation4 + $0xb8] sm:$0xff]  ;;  %v62_v36 = vld [vmem:[#allocation4 + $0xc0] sm:$0xff]  ;;  %v63_v37 = vld [vmem:[#allocation4 + $0xc8] sm:$0xff] }
  0x2e   :  { %437 = vmatprep.subr.bf16.mxu1 %v542_v0  ;;  %v459_v35 = vpack.c.bf16 %v61_v34, %v60_v32  ;;  %v462_v38 = vpack.c.bf16 %v63_v37, %v62_v36  ;;  %v64_v39 = vld [vmem:[#allocation4 + $0xd0] sm:$0xff]  ;;  %v65_v40 = vld [vmem:[#allocation4 + $0xd8] sm:$0xff]  ;;  %v66_v42 = vld [vmem:[#allocation4 + $0xe0] sm:$0xff] }
  0x2f   :  { %457 = vmatpush3.bf16.msra.mxu0 %v456_v33  ;;  %v465_v41 = vpack.c.bf16 %v65_v40, %v64_v39  ;;  %v67_v43 = vld [vmem:[#allocation4 + $0xe8] sm:$0xff]  ;;  %v310_v45 = vld [vmem:[#allocation4 + $0x10] ss:$0 sm:$0xff]  ;;  %v69_v51 = vld [vmem:[#allocation4 + $0xf8] sm:$0xff] }
  0x30   :  { %458 = vmatprep.subr.bf16.mxu0 %v542_v0  ;;  %v468_v44 = vpack.c.bf16 %v67_v43, %v66_v42  ;;  %v68_v50 = vld [vmem:[#allocation4 + $0xf0] sm:$0xff]  ;;  %v70_v53 = vld [vmem:[#allocation4 + $0x100] sm:$0xff]  ;;  %v71_v54 = vld [vmem:[#allocation4 + $0x108] sm:$0xff] }
  0x31   :  { %439 = vmatpush3.bf16.msra.mxu1 %v438_v14  ;;  %v471_v52 = vpack.c.bf16 %v69_v51, %v68_v50  ;;  %v474_v55 = vpack.c.bf16 %v71_v54, %v70_v53  ;;  %v72_v56 = vld [vmem:[#allocation4 + $0x110] sm:$0xff]  ;;  %v73_v57 = vld [vmem:[#allocation4 + $0x118] sm:$0xff]  ;;  %v313_v1 = vld [vmem:[#allocation4 + $0x120] ss:$0 sm:$0xff] }
  0x32   :  { %440 = vmatprep.subr.bf16.mxu1 %v542_v0  ;;  %v477_v58 = vpack.c.bf16 %v73_v57, %v72_v56  ;;  %v312_v59 = vld [vmem:[#allocation4 + $0x98] ss:$0 sm:$0xff] }
  0x33   :  { %460 = vmatpush3.bf16.msra.mxu0 %v459_v35 }
  0x34   :  { %461 = vmatprep.subr.bf16.mxu0 %v542_v0 }
  0x35   :  { %442 = vmatpush3.bf16.msra.mxu1 %v441_v17 }
  0x36   :  { %443 = vmatprep.subr.bf16.mxu1 %v542_v0 }
  0x37   :  { %463 = vmatpush3.bf16.msra.mxu0 %v462_v38 }
  0x38   :  { %464 = vmatprep.subr.bf16.mxu0 %v542_v0 }
  0x39   :  { %445 = vmatpush3.bf16.msra.mxu1 %v444_v20 }
  0x3a   :  { %446 = vmatprep.subr.bf16.mxu1 %v542_v0 }
  0x3b   :  { %466 = vmatpush3.bf16.msra.mxu0 %v465_v41 }
  0x3c   :  { %467 = vmatprep.subr.bf16.mxu0 %v542_v0 }
  0x3d   :  { %448 = vmatpush3.bf16.msra.mxu1 %v447_v23 }
  0x3e   :  { %449 = vmatprep.subr.bf16.mxu1 %v542_v0 }
  0x3f   :  { %469 = vmatpush3.bf16.msra.mxu0 %v468_v44 }
  0x40   :  { %470 = vmatprep.subr.bf16.mxu0 %v542_v0 }
  0x41   :  { %451 = vmatpush3.bf16.msra.mxu1 %v450_v26 }
  0x42   :  { %452 = vmatprep.subr.bf16.mxu1 %v542_v0 }
  0x43   :  { %472 = vmatpush3.bf16.msra.mxu0 %v471_v52 }
  0x44   :  { %473 = vmatprep.subr.bf16.mxu0 %v542_v0 }
  0x45   :  { %454 = vmatpush3.bf16.msra.mxu1 %v453_v29 }
  0x47   :  { %475 = vmatpush3.bf16.msra.mxu0 %v474_v55 }
  0x48   :  { %476 = vmatprep.subr.bf16.mxu0 %v542_v0 }
  0x4b   :  { %478 = vmatpush3.bf16.msra.mxu0 %v477_v58 }
  0xff   :  { %v149_v46 = vpop.f32.mrb[0].mxu0 }
 0x100   :  { %v150_v47 = vadd.f32 %v310_v45, %v149_v46  ;;  %v357_v48 = vpop.f32.mrb[1].mxu0 }
 0x102   :  { %486 = vtanh.f32 %v150_v47 }
 0x10c   :  { %v487_v49 = vpop.eup %486 }
 0x10d   :  { %391 = vmatmul.mubr.f32.vlgmr.msra.gmra.mrb[0].mxu1 %v487_v49 }
 0x1e0   :  { %v224_v60 = vpop.f32.mrb[0].mxu1 }
 0x1e1   :  { %v225_v61 = vadd.f32 %v312_v59, %v224_v60  ;;  %v392_v62 = vpop.f32.mrb[1].mxu1 }
 0x1e3   :  { %488 = vtanh.f32 %v225_v61 }
 0x1ed   :  { %v489_v63 = vpop.eup %488 }
 0x1ee   :  { %426 = vmatmul.mubr.f32.vlgmr.msra.gmra.mrb[2].mxu0 %v489_v63 }
 0x2c1   :  { %v299_v2 = vpop.f32.mrb[2].mxu0 }
 0x2c2   :  { %v300_v3 = vadd.f32 %v313_v1, %v299_v2  ;;  %v427_v4 = vpop.f32.mrb[3].mxu0 }
 0x2c4   :  { %303 = vst [vmem:[%s616_s2] sm:$0xff] %v300_v3 }
 0x2c5   :  { %308 = vsyncpa [#allocation3], 1 }
 0x2c6   :  { %309 = vsyncpa [#allocation5], 1 }

</bundles_post_ra>
